<compile_context>
chip_gen: v6e
topology: v6e:2x2x1
jax: 0.10.0
libtpu: 0.0.40
codegen_flags: <defaults>
</compile_context>

<pallas_src>
import functools
import math

import numpy as np
import jax
import jax.numpy as jnp
from jax import lax
from jax.experimental import pallas as pl
from jax.experimental.pallas import tpu as pltpu

UP_K = 16      # ConvTranspose2d kernel size
UP_S = 8       # stride
UP_P = 4       # padding


# ----------------------------- fixed bilinear upsample matrices -----------------------------
def _bilinear_filter_1d(k=UP_K):
    """1-D factor of fill_up_weights' bilinear kernel (it is separable)."""
    f = math.ceil(k / 2)
    c = (2 * f - 1 - f % 2) / (2.0 * f)
    return np.array([1.0 - abs(i / f - c) for i in range(k)], dtype=np.float32)


def _upsample_matrix(n_in, k=UP_K, stride=UP_S, pad=UP_P):
    """Dense (n_in, n_out) matrix M with out = in @ M == 1-D ConvTranspose (taps exact in bf16)."""
    g = _bilinear_filter_1d(k)
    n_out = (n_in - 1) * stride - 2 * pad + k          # = 8 * n_in
    m = np.zeros((n_in, n_out), dtype=np.float32)
    for i in range(n_in):
        for kk in range(k):
            o = i * stride - pad + kk
            if 0 <= o < n_out:
                m[i, o] = g[kk]
    return m


# ----------------------------- small sizing helpers -----------------------------
def _largest_divisor(total, cap, step):
    """Largest multiple of `step` dividing `total` and <= cap (requires total % step == 0)."""
    d = min(total, max(step, (cap // step) * step))
    while total % d != 0:
        d -= step
    return d


def _vmem_limit(need_bytes):
    # Right-size the scoped VMEM limit: actual block/scratch footprint + margin,
    # capped well below physical VMEM (64 MiB v7x, 128 MiB v5e/v6e).
    return int(min(max(need_bytes + (8 << 20), 16 << 20), 96 << 20))


# ----------------------------- kernel 1: 1x1 seg conv -----------------------------
def _seg_conv_kernel(x_ref, w_ref, b_ref, o_ref):
    """x_ref (1,Cin,HWt), w_ref (C,Cin), b_ref (C,1), o_ref (1,C,HWt) f32."""
    s = jnp.dot(w_ref[...], x_ref[0], preferred_element_type=jnp.float32)   # (C, HWt)
    o_ref[0] = (s + b_ref[...]).astype(o_ref.dtype)


# ----------------------------- kernel 2: bilinear up + log-softmax head -----------------------------
def _upsample_head_kernel(s_ref, u_ref, vt_ref, o_ref, t_ref, m_ref, e_ref, *, training):
    """
    s_ref : (1, C, H, W)        seg-conv output (bias already added)
    u_ref : (W, 8W)             horizontal bilinear-upsample matrix
    vt_ref: (band, H)           vertical bilinear-upsample matrix, rows for this band
    o_ref : (1, C, band, 8W)    output block (resident for the whole grid step)
    t_ref : (C, H, 8W)          scratch: horizontally-upsampled planes, persists across bands
    m_ref : (band, 8W) f32      scratch: running max / log-sum-exp
    e_ref : (band, 8W) f32      scratch: running sum of exp
    """
    c = s_ref.shape[1]
    n_class = c - 3
    f32 = jnp.float32
    cdt = t_ref.dtype
    odt = o_ref.dtype

    # ---- Stage A (once per batch element): horizontal upsample, per channel ----
    @pl.when(pl.program_id(1) == 0)
    def _():
        def horiz(cc, carry):
            t_ref[cc] = jnp.dot(s_ref[0, cc], u_ref[...],
                                preferred_element_type=f32).astype(cdt)     # (H, 8W)
            return carry
        lax.fori_loop(0, c, horiz, 0, unroll=2)

    # ---- Stage B (per output-row band): vertical upsample straight into o_ref ----
    def vert(cc, carry):
        o_ref[0, cc] = jnp.dot(vt_ref[...], t_ref[cc],
                               preferred_element_type=f32).astype(odt)      # (band, 8W)
        return carry
    lax.fori_loop(0, c, vert, 0, unroll=2)

    # ---- eval-mode clamp of the disparity channel (index C-3) ----
    if not training:
        o_ref[0, c - 3] = jnp.clip(o_ref[0, c - 3].astype(f32), 0.0, 128.0).astype(odt)

    # ---- in-place, numerically-stable log-softmax over the class channels ----
    # (output dtype is f32 here; for a bf16 output, keep an f32 scratch of the class
    #  planes instead of re-reading the rounded o_ref values.)
    m_ref[...] = o_ref[0, 0].astype(f32)

    def run_max(cc, carry):
        m_ref[...] = jnp.maximum(m_ref[...], o_ref[0, cc].astype(f32))
        return carry
    lax.fori_loop(1, n_class, run_max, 0)

    e_ref[...] = jnp.zeros_like(e_ref)

    def run_sum(cc, carry):
        e_ref[...] = e_ref[...] + jnp.exp(o_ref[0, cc].astype(f32) - m_ref[...])
        return carry
    lax.fori_loop(0, n_class, run_sum, 0)

    m_ref[...] = m_ref[...] + jnp.log(e_ref[...])          # log-sum-exp

    def write_lsm(cc, carry):
        o_ref[0, cc] = (o_ref[0, cc].astype(f32) - m_ref[...]).astype(odt)
        return carry
    lax.fori_loop(0, n_class, write_lsm, 0)
    # channels C-2, C-1 (offsets) stay as written by the vertical stage.


# ----------------------------- wrapper -----------------------------
def drn_offset_disparity_head(feat, w_seg, b_seg, *, training=False):
    """Pallas forward for DRNOffsetDisparity (post-backbone head).

    feat  : (N, Cin, H, W)   output of self.base(x)
    w_seg : (C, Cin, 1, 1)   1x1 conv weight, C = classes + 3
    b_seg : (C,)             1x1 conv bias
    returns (N, C, 8H, 8W)
    """
    n, cin, h, w = feat.shape
    c = w_seg.shape[0]
    assert c >= 4, "need at least one class channel plus 3 offset/disparity channels"
    h8, w8 = 8 * h, 8 * w
    hw = h * w

    # MXU operand dtype: keep bf16 features in bf16 (full-rate MXU), else f32.
    cdt = jnp.bfloat16 if feat.dtype == jnp.bfloat16 else jnp.float32
    itm = jnp.dtype(cdt).itemsize
    obytes = jnp.dtype(feat.dtype).itemsize

    wseg2d = w_seg.reshape(c, cin).astype(cdt)
    bias2d = b_seg.reshape(c, 1).astype(jnp.float32)
    u = jnp.asarray(_upsample_matrix(w)).astype(cdt)        # (W, 8W)
    vt = jnp.asarray(_upsample_matrix(h).T).astype(cdt)     # (8H, H)

    # ---------------- kernel 1: 1x1 conv as fat, lane-dense matmuls ----------------
    x_flat = feat.reshape(n, cin, hw).astype(cdt)           # free HBM reshape
    if hw % 128 == 0:
        hw_t = _largest_divisor(hw, max(128, (8 << 20) // (cin * itm)), 128)
    else:
        hw_t = hw
    n_hw = hw // hw_t

    k1_need = 2 * (cin * hw_t * itm + c * hw_t * 4 + c * cin * itm + c * 4)
    s_flat = pl.pallas_call(
        _seg_conv_kernel,
        out_shape=jax.ShapeDtypeStruct((n, c, hw), jnp.float32),
        grid=(n, n_hw),
        in_specs=[
            pl.BlockSpec((1, cin, hw_t), lambda b, j: (b, 0, j)),
            pl.BlockSpec((c, cin), lambda b, j: (0, 0)),
            pl.BlockSpec((c, 1), lambda b, j: (0, 0)),
        ],
        out_specs=pl.BlockSpec((1, c, hw_t), lambda b, j: (b, 0, j)),
        compiler_params=pltpu.CompilerParams(
            dimension_semantics=("parallel", "parallel"),
            vmem_limit_bytes=_vmem_limit(k1_need)),
    )(x_flat, wseg2d, bias2d)

    # ---------------- kernel 2: separable bilinear up + log-softmax / clamp ----------------
    s4 = s_flat.reshape(n, c, h, w).astype(cdt)              # free HBM reshape
    band = _largest_divisor(h8, max(8, (10 << 20) // (c * w8 * obytes)), 8)
    n_band = h8 // band

    k2_need = (2 * (c * h * w * itm + w * w8 * itm + band * h * itm
                    + c * band * w8 * obytes)
               + c * h * w8 * itm + 2 * band * w8 * 4)
    kernel = functools.partial(_upsample_head_kernel, training=training)
    out = pl.pallas_call(
        kernel,
        out_shape=jax.ShapeDtypeStruct((n, c, h8, w8), feat.dtype),
        grid=(n, n_band),
        in_specs=[
            pl.BlockSpec((1, c, h, w), lambda b, j: (b, 0, 0, 0)),
            pl.BlockSpec((w, w8), lambda b, j: (0, 0)),
            pl.BlockSpec((band, h), lambda b, j: (j, 0)),
        ],
        out_specs=pl.BlockSpec((1, c, band, w8), lambda b, j: (b, 0, j, 0)),
        scratch_shapes=[
            pltpu.VMEM((c, h, w8), cdt),            # horizontally-upsampled planes
            pltpu.VMEM((band, w8), jnp.float32),    # running max / lse
            pltpu.VMEM((band, w8), jnp.float32),    # running sum of exp
        ],
        compiler_params=pltpu.CompilerParams(
            dimension_semantics=("parallel", "arbitrary"),
            vmem_limit_bytes=_vmem_limit(k2_need)),
    )(s4, u, vt)
    return out


# ----------------------------- reference (plain JAX) -----------------------------
def _bilinear_kernel_2d(k=UP_K):
    g = _bilinear_filter_1d(k)
    return np.outer(g, g).astype(np.float32)


def _reference(feat, w_seg, b_seg, *, training=False):
    c = w_seg.shape[0]
    s = jax.lax.conv_general_dilated(
        feat, w_seg, window_strides=(1, 1), padding="VALID",
        dimension_numbers=("NCHW", "OIHW", "NCHW")) + b_seg.reshape(1, -1, 1, 1)
    w_up = jnp.asarray(np.tile(_bilinear_kernel_2d()[None, None], (c, 1, 1, 1)))
    y = jax.lax.conv_general_dilated(
        s, w_up, window_strides=(1, 1),
        padding=((UP_K - 1 - UP_P, UP_K - 1 - UP_P),) * 2,
        lhs_dilation=(UP_S, UP_S),
        dimension_numbers=("NCHW", "OIHW", "NCHW"),
        feature_group_count=c)
    if not training:
        y = y.at[:, -3].set(jnp.clip(y[:, -3], 0.0, 128.0))
    lsm = jax.nn.log_softmax(y[:, :-3], axis=1)
    return jnp.concatenate([lsm, y[:, -3:]], axis=1)


if __name__ == "__main__":
    # Small shapes standing in for the head: Cin = model.out_dim, classes = 4.
    N, CIN, CLASSES, H, W = 2, 32, 4, 16, 16
    C = CLASSES + 3

    key = jax.random.PRNGKey(0)
    kx, kw, kb = jax.random.split(key, 3)

    # seg init mimicking the module: normal(0, sqrt(2/n)), n = kh*kw*out_channels.
    n_fan = 1 * 1 * C
    w_seg = jax.random.normal(kw, (C, CIN, 1, 1), jnp.float32) * math.sqrt(2.0 / n_fan)
    # module zeroes the bias; use a small nonzero bias here to exercise the bias path.
    b_seg = 0.1 * jax.random.normal(kb, (C,), jnp.float32)

    feat = jax.random.normal(kx, (N, CIN, H, W), jnp.float32)   # stands in for self.base(x)

    y = drn_offset_disparity_head(feat, w_seg, b_seg, training=False)
    y = jax.block_until_ready(y)

    y_ref = _reference(feat, w_seg, b_seg, training=False)
    assert y.shape == (N, C, 8 * H, 8 * W), y.shape
    max_err = float(jnp.max(jnp.abs(y - y_ref)))
    assert jnp.allclose(y, y_ref, atol=1e-4, rtol=1e-4), max_err

    print("KERNEL_OK")
</pallas_src>

<mosaic_0001>
module attributes {stable_mosaic.version = 11 : i64} {
  func.func @_seg_conv_kernel(%arg0: i32, %arg1: i32, %arg2: memref<1x32x256xf32, #tpu.memory_space<vmem>>, %arg3: memref<7x32xf32, #tpu.memory_space<vmem>>, %arg4: memref<7x1xf32, #tpu.memory_space<vmem>>, %arg5: memref<1x7x256xf32, #tpu.memory_space<vmem>>) attributes {dimension_semantics = [#tpu.dimension_semantics<parallel>, #tpu.dimension_semantics<parallel>], iteration_bounds = array<i64: 2, 1>, scalar_prefetch = 0 : i64, scratch_operands = 0 : i64, tpu.core_type = #tpu.core_type<tc>, window_params = [{transform_indices = @transform_0, window_bounds = array<i64: 1, 32, 256>}, {pipeline_mode = #tpu.pipeline_mode<synchronous>, transform_indices = @transform_1, window_bounds = array<i64: 7, 32>}, {pipeline_mode = #tpu.pipeline_mode<synchronous>, transform_indices = @transform_2, window_bounds = array<i64: 7, 1>}, {transform_indices = @transform_3, window_bounds = array<i64: 1, 7, 256>}]} {
    %c0 = arith.constant 0 : index
    %c0_0 = arith.constant 0 : index
    %0 = vector.load %arg3[%c0, %c0_0] : memref<7x32xf32, #tpu.memory_space<vmem>>, vector<7x32xf32>
    %c0_1 = arith.constant 0 : index
    %c0_2 = arith.constant 0 : index
    %c0_3 = arith.constant 0 : index
    %1 = vector.load %arg2[%c0_1, %c0_2, %c0_3] : memref<1x32x256xf32, #tpu.memory_space<vmem>>, vector<1x32x256xf32>
    %2 = vector.shape_cast %1 : vector<1x32x256xf32> to vector<32x256xf32>
    %cst = arith.constant dense<0.000000e+00> : vector<7x256xf32>
    %3 = tpu.matmul %0, %2, %cst {dimension_numbers = #tpu.dot_dimension_numbers<[1], [0], [0], [1], [0, 0, 1, 1], [], []>} : vector<7x32xf32>, vector<32x256xf32>, vector<7x256xf32> -> vector<7x256xf32>
    %c0_4 = arith.constant 0 : index
    %c0_5 = arith.constant 0 : index
    %4 = vector.load %arg4[%c0_4, %c0_5] : memref<7x1xf32, #tpu.memory_space<vmem>>, vector<7x1xf32>
    %5 = vector.broadcast %4 : vector<7x1xf32> to vector<7x256xf32>
    %6 = arith.addf %3, %5 : vector<7x256xf32>
    %c0_6 = arith.constant 0 : index
    %c0_7 = arith.constant 0 : index
    %c0_8 = arith.constant 0 : index
    %7 = vector.load %arg5[%c0_6, %c0_7, %c0_8] : memref<1x7x256xf32, #tpu.memory_space<vmem>>, vector<1x7x256xf32>
    %8 = vector.shape_cast %7 : vector<1x7x256xf32> to vector<7x256xf32>
    %9 = vector.shape_cast %6 : vector<7x256xf32> to vector<1x7x256xf32>
    tpu.vector_store %arg5[%c0_6, %c0_7, %c0_8], %9 {strides = array<i32>} : memref<1x7x256xf32, #tpu.memory_space<vmem>>, vector<1x7x256xf32>,
    return
  }
  func.func @transform_0(%arg0: i32, %arg1: i32) -> (i32, i32, i32) {
    %c0_i32 = arith.constant 0 : i32
    %c0_i32_0 = arith.constant 0 : i32
    return %arg0, %c0_i32, %arg1 : i32, i32, i32
  }
  func.func @transform_1(%arg0: i32, %arg1: i32) -> (i32, i32) {
    %c0_i32 = arith.constant 0 : i32
    %c0_i32_0 = arith.constant 0 : i32
    %c0_i32_1 = arith.constant 0 : i32
    return %c0_i32, %c0_i32_0 : i32, i32
  }
  func.func @transform_2(%arg0: i32, %arg1: i32) -> (i32, i32) {
    %c0_i32 = arith.constant 0 : i32
    %c0_i32_0 = arith.constant 0 : i32
    %c0_i32_1 = arith.constant 0 : i32
    return %c0_i32, %c0_i32_0 : i32, i32
  }
  func.func @transform_3(%arg0: i32, %arg1: i32) -> (i32, i32, i32) {
    %c0_i32 = arith.constant 0 : i32
    %c0_i32_0 = arith.constant 0 : i32
    return %arg0, %c0_i32, %arg1 : i32, i32, i32
  }
}

</mosaic_0001>

<bundles_post_ra>
// kernel: tpu_custom_call.1
= control target key start
LH: loop header
LB: loop body
LE: loop exit
PB: predicated region body
PF: predicated region fallthrough
CT: control target
= control target key end

     0   :  { %8 = vsyncpa [#allocation3], 0  ;;  %s689_s0 = inlined_call_operand.hbm [shape: f32[2,32,256], index: 0, kind: input, shape index: {}]   ;;  %s690_s1 = inlined_call_operand.vmem [shape: f32[7,32], index: 1, kind: input, shape index: {}]   ;;  %s691_s2 = inlined_call_operand.vmem [shape: f32[7,1], index: 2, kind: input, shape index: {}]   ;;  %s692_s3 = inlined_call_operand.vmem [shape: f32[2,7,256], index: 3, kind: output, shape index: {}]  }
   0x1   :  { %10 = vsyncpa [#allocation3 + $0x1], 0  ;;  %s587_s12 = smov 0   ;;  %s589_s13 = smov 0  }
   0x2   :  { %s591_s14 = smov 0   ;;  %s593_s15 = smov 0  }
   0x3   :  { %s595_s16 = smov 0   ;;  %s597_s17 = smov 0  }
   0x4 LB: > { %s406_s18 = sadd.s32 4294967295, %s560_s17   ;;  %s28_s19 = sadd.s32 1, %s556_s16  ;;  %s560_s17 = sphi %s597_s17, %s16_s17   ;;  %s556_s16 = sphi %s595_s16, %s700_s16   ;;  %s552_s15 = sphi %s593_s15, %s699_s15   ;;  %s548_s14 = sphi %s591_s14, %s698_s14   ;;  %s544_s13 = sphi %s589_s13, %s697_s13   ;;  %s540_s12 = sphi %s587_s12, %s696_s12  }
   0x5   : > { %p30_p0 = scmp.ge.s32.totalorder %s28_s19, 2  ;;  %s37_s20 = sadd.s32 1, %s548_s14 }
   0x6   : > { %p44_p1 = scmp.ne.s32.totalorder %s548_s14, %s544_s13  ;;  %p45_p2 = scmp.eq.s32.totalorder %s560_s17, 0 }
   0x7   : > { %s702_s19 = smov (%p30_p0, %s28_s19), 0  ;;  %p50_p4 = scmp.ne.s32.totalorder %s544_s13, %s540_s12 }
   0x8   : > { %p623_p3 = por %p45_p2, %p44_p1  ;;  %s32_s22 = ssub.s32 %s556_s16, %s702_s19 }
   0x9   : > { %p51_p5 = scmp.eq.s32.totalorder %s406_s18, 0  ;;  %p35_p6 = scmp.eq.s32.totalorder %s32_s22, 0 }
   0xa   : > { %p428_p8 = scmp.lt.s32.totalorder %s560_s17, 2  ;;  %s150_s25 = sand.u32 1, %s548_s14  }
   0xb   : > { %p630_p7 = por %p51_p5, %p50_p4  ;;  %s420_s26 = sshll.u32 %s556_s16, 10 }
   0xc   : > { %s636_s24 = scalar_select %p35_p6, %s548_s14, %s37_s20  }
   0xd   : > { %s410_s27 = sshll.u32 %s150_s25, 6  ;;  %s162_s30 = scalar_lea.hbm %s689_s0, %s420_s26 }
   0xe   : > { %s154_s4 = scalar_lea.vmem [#allocation2], %s410_s27  ;;  %p645_p9 = pnand %p428_p8, %p623_p3 }
   0xf   : > { %s163_s5 = sshll.u32 %s154_s4, 4  ;;  %s151_s7 = scalar_lea.sflag [#allocation3], %s150_s25  ;;  %s164_s5 = int_to_ptr.vmem [resolvable:$true] %s163_s5 }
  0x10   : > { %p484_p10 = pneg %p645_p9  ;;  %s495_s8 = scalar_lea.vmem %s164_s5, 1024 }
  0x11   : > { %p496_p11 = scmp.ne.s32.totalorder %s164_s5, %s495_s8  ;;  %s562_s9 = smov [#allocation2]  }
  0x12   : > { %s500_s10 = sshll.u32 %s562_s9, 4  ;;  %s501_s10 = int_to_ptr.vmem [resolvable:$false] %s500_s10 }
  0x13   : > { %p498_p12 = pnand %p496_p11, %p484_p10  ;;  %s502_s11 = scalar_lea.vmem %s501_s10, 2048 }
  0x14   : > { %p503_p0 = scmp.lt.s32.totalorder %s164_s5, %s501_s10  ;;  %p504_p1 = scmp.lt.s32.totalorder %s502_s11, %s495_s8 }
  0x15   : > { %p499_p13 = pneg %p498_p12 }
  0x16   : > { %p505_p2 = por %p504_p1, %p503_p0 }
  0x18   : > { %p506_p3 = pnand %p505_p2, %p499_p13 }
  0x1a   : > { %509 = shalt.err (!%p506_p3)
}
  0x1b   : > { %s563_s12 = smov 256   ;;  %s564_s18 = smov 16  }
  0x1c   : > { %427 = dma.hbm_to_vmem [thread:$0]  (!%p645_p9), %s162_s30, 1024, %s164_s5, %s151_s7, %s563_s12, %s563_s12, %s564_s18  }
  0x1d   : > { %p413_p4 = scmp.ge.s32.totalorder %s560_s17, 1  ;;  %p171_p5 = scmp.lt.s32.totalorder %s560_s17, 3 }
  0x1f   : > { %p172_p6 = pnand %p413_p4, %p171_p5 }
  0x20   : > { %s177_s20 = sand.u32 (!%p172_p6), 1, %s544_s13  }
  0x21   : > { %175 = sbr.rel (%p172_p6) target bundleno = 247 (0xf7), region = 32  ;;  %s414_s21 = sshll.u32 (!%p172_p6), %s177_s20, 6 }
  0x22   : > { %s178_s22 = scalar_lea.sflag (!%p172_p6), [#allocation3], %s177_s20  ;;  %s181_s25 = scalar_lea.vmem (!%p172_p6), [#allocation2], %s414_s21 }
  0x26   : > { %535 = dma.done.wait (%p630_p7), %s178_s22, 1024  }
  0x27   : > { %537 = vsyncadd (%p630_p7), %s178_s22, 4294966272  ;;  %v565_v0 = vmov 0.0   ;;  %v566_v1 = vmov 0   ;;  %v227_v2 = vld [vmem:[%s181_s25 + $0x38] sm:$0xff]  ;;  %v226_v3 = vld [vmem:[%s181_s25 + $0x30] sm:$0xff]  ;;  %vm234_vm0 = vcmask 261120  }
  0x28   : > { %302 = vmatprep.mubr.f32.mxu0 %v565_v0  ;;  %481 = vset.pattern.permute.xlu0 %v566_v1  ;;  %v225_v4 = vld [vmem:[%s181_s25 + $0x28] sm:$0xff]  ;;  %v224_v5 = vld [vmem:[%s181_s25 + $0x20] sm:$0xff]  ;;  %v223_v6 = vld [vmem:[%s181_s25 + $0x18] sm:$0xff]  ;;  %p210_p7 = scmp.lt.s32.totalorder %s552_s15, 1 }
  0x29   : > { %262 = vmatprep.subr.mxu0 %v227_v2  ;;  %v222_v7 = vld [vmem:[%s181_s25 + $0x10] sm:$0xff]  ;;  %v228_v8 = vld [vmem:[%s691_s2] sm:$0x7f]  ;;  %v221_v9 = vld [vmem:[%s181_s25 + $0x8] sm:$0xff] }
  0x2a   : > { %263 = vmatpush1.msra.mxu0 %v226_v3  ;;  %231 = vperm.xlu0 %481, %v228_v8   ;;  %v220_v10 = vld [vmem:[%s181_s25] sm:$0xff]  ;;  %s704_s15 = smov (!%p210_p7, %s552_s15), 1 }
  0x2b   : > { %264 = vmatprep.subr.mxu0 %v225_v4  ;;  %v219_v11 = vld [vmem:[%s690_s1] sm:$0x7f]  ;;  %s421_s29 = sshll.u32 %s704_s15, 4 }
  0x2c   : > { %265 = vmatpush1.msra.mxu0 %v224_v5  ;;  %s217_s5 = scalar_lea.vmem %s692_s3, %s421_s29 }
  0x2d   : > { %266 = vmatprep.subr.mxu0 %v223_v6 }
  0x2e   : > { %267 = vmatpush1.msra.mxu0 %v222_v7 }
  0x2f   : > { %268 = vmatprep.subr.mxu0 %v221_v9 }
  0x30   : > { %269 = vmatpush1.msra.mxu0 %v220_v10 }
  0x31   : > { %417 = vmatmul.mubr.msk.f32.vlgmr.msra.gmra.mxu0 %vm234_vm0, %v219_v11 }
  0xa5   : > { %v232_v12 = vpop.permute.xlu0 %231 }
  0xf1   : > { %v304_v13 = vpop.f32.mrf.mxu0 }
  0xf2   : > { %v305_v14 = vadd.f32 %v304_v13, %v232_v12 }
  0xf3   : > { %v306_v15 = vpop.f32.mrf.mxu0 }
  0xf4   : > { %309 = vst [vmem:[%s217_s5] sm:$0x7f] %v305_v14  ;;  %v307_v16 = vadd.f32 %v306_v15, %v232_v12 }
  0xf6   : > { %310 = vst [vmem:[%s217_s5 + $0x8] sm:$0x7f] %v307_v16 }
  0xf7 PF: > { %s16_s17 = sadd.s32 1, %s560_s17   ;;  %s696_s12 = smov %s544_s13 }
  0xf8   : > { %p13_p8 = scmp.ge.s32.totalorder %s16_s17, 4   ;;  %s697_s13 = smov %s548_s14 }
  0xf9   : > { %s698_s14 = smov %s636_s24  ;;  %s699_s15 = smov %s556_s16 }
  0xfa   : > { %s700_s16 = smov %s702_s19  ;;  %15 = sbr.rel (!%p13_p8) target bundleno = 4 (0x4), region = 72 }
  0xff   :  { %341 = vsyncpa [#allocation3], 1 }
 0x100   :  { %343 = vsyncpa [#allocation3 + $0x1], 1 }

</bundles_post_ra>
